<compile_context>
chip_gen: v7x
topology: tpu7x:2x2x1
jax: 0.10.0
libtpu: 0.0.40
codegen_flags: <defaults>
</compile_context>

<pallas_src>
import functools

import jax
import jax.numpy as jnp
from jax.experimental import pallas as pl
from jax.experimental.pallas import tpu as pltpu

BN_EPS = 1e-5


# ----------------------------------------------------------------------------
# Small helpers shared by the kernels (traced inline)
# ----------------------------------------------------------------------------
def _bn_phase(zr, zi, scale, shift, relu):
    """[ReLU](|z|*scale + shift) * exp(i*stable_angle(z)) via one rsqrt."""
    sq = zr * zr + zi * zi
    nz = sq > 0.0
    inv = jax.lax.rsqrt(jnp.where(nz, sq, 1.0))
    mag = jnp.where(nz, sq * inv, 0.0)
    y = mag * scale + shift
    if relu:
        y = jnp.maximum(y, 0.0)
    ur = jnp.where(nz, zr * inv, 1.0)   # cos(stable_angle(z))
    ui = jnp.where(nz, zi * inv, 0.0)   # sin(stable_angle(z))
    return y * ur, y * ui


def _gauss_cplx_dot(ar, ai, wr_b, wi_b, ws_b):
    """3-mul complex matmul: bf16 MXU inputs, f32 accumulation."""
    rr = jnp.dot(ar.astype(jnp.bfloat16), wr_b, preferred_element_type=jnp.float32)
    ii = jnp.dot(ai.astype(jnp.bfloat16), wi_b, preferred_element_type=jnp.float32)
    tt = jnp.dot((ar + ai).astype(jnp.bfloat16), ws_b,
                 preferred_element_type=jnp.float32)
    return rr - ii, tt - rr - ii


def _stats_epilogue(zr, zi, sum_ref, ssq_ref):
    """Per-block partial sum(|z|) and sum(|z|^2) per channel (no sqrt for sumsq)."""
    sq = zr * zr + zi * zi
    nz = sq > 0.0
    inv = jax.lax.rsqrt(jnp.where(nz, sq, 1.0))
    mag = jnp.where(nz, sq * inv, 0.0)
    sum_ref[...] = jnp.sum(mag, axis=0, keepdims=True)[None]
    ssq_ref[...] = jnp.sum(sq, axis=0, keepdims=True)[None]


# ----------------------------------------------------------------------------
# Pallas kernels
# ----------------------------------------------------------------------------
def conv1x1_stats_kernel(ar_ref, ai_ref, wr_ref, wi_ref, ws_ref, br_ref, bi_ref,
                         zr_ref, zi_ref, sum_ref, ssq_ref):
    """Complex 1x1 conv (matmul) + bias + per-channel |z| stats epilogue."""
    zr, zi = _gauss_cplx_dot(ar_ref[...], ai_ref[...],
                             wr_ref[...], wi_ref[...], ws_ref[...])
    zr = zr + br_ref[...]
    zi = zi + bi_ref[...]
    zr_ref[...] = zr
    zi_ref[...] = zi
    _stats_epilogue(zr, zi, sum_ref, ssq_ref)


def bn_conv1x1_stats_kernel(zr_ref, zi_ref, sc_ref, sh_ref,
                            wr_ref, wi_ref, ws_ref, br_ref, bi_ref,
                            or_ref, oi_ref, sum_ref, ssq_ref):
    """BN+ReLU+phase prologue, then complex 1x1 conv + bias + stats epilogue."""
    hr, hi = _bn_phase(zr_ref[...], zi_ref[...], sc_ref[...], sh_ref[...], relu=True)
    zr, zi = _gauss_cplx_dot(hr, hi, wr_ref[...], wi_ref[...], ws_ref[...])
    zr = zr + br_ref[...]
    zi = zi + bi_ref[...]
    or_ref[...] = zr
    oi_ref[...] = zi
    _stats_epilogue(zr, zi, sum_ref, ssq_ref)


def bn_conv3x3_stats_kernel(hp_ref, wp_ref, zr_ref, zi_ref, sc_ref, sh_ref,
                            wr_ref, wi_ref, ws_ref, br_ref, bi_ref,
                            or_ref, oi_ref, sum_ref, ssq_ref,
                            *, H, W, roll_like_jnp):
    """BN+ReLU+phase prologue, then a 3x3 (pad=1, stride=1) complex conv over one
    image per grid step.  The real / imag / (real+imag) planes are concatenated
    along lanes into one (HW, 3K) slab so each of the 9 taps costs one sublane
    roll + one mask multiply + one bf16 cast; zero-padding masks are computed
    in-kernel from (HW,1) row/col index vectors.  Per-channel |z| stats epilogue."""
    HW = H * W
    hr, hi = _bn_phase(zr_ref[...], zi_ref[...], sc_ref[...], sh_ref[...], relu=True)
    K = hr.shape[-1]
    cout = br_ref.shape[-1]
    h3 = jnp.concatenate([hr, hi, hr + hi], axis=-1)        # (HW, 3K)
    hpos = hp_ref[...]                                       # (HW, 1) f32 row index
    wpos = wp_ref[...]                                       # (HW, 1) f32 col index
    rr = jnp.zeros((HW, cout), jnp.float32)
    ii = jnp.zeros((HW, cout), jnp.float32)
    tt = jnp.zeros((HW, cout), jnp.float32)
    for dh in (-1, 0, 1):
        for dw in (-1, 0, 1):
            k = (dh + 1) * 3 + (dw + 1)
            if dh == 0 and dw == 0:
                a = h3                                       # center tap: no roll/mask
            else:
                s = dh * W + dw                              # want a[r] = h[(r + s) mod HW]
                shift = ((-s) if roll_like_jnp else s) % HW
                a = pltpu.roll(h3, shift=shift, axis=0)
                valid = ((hpos + dh >= 0.0) & (hpos + dh <= H - 1)
                         & (wpos + dw >= 0.0) & (wpos + dw <= W - 1))
                a = a * valid.astype(jnp.float32)            # zero-padding mask
            ab = a.astype(jnp.bfloat16)
            rr += jnp.dot(ab[:, :K], wr_ref[k], preferred_element_type=jnp.float32)
            ii += jnp.dot(ab[:, K:2 * K], wi_ref[k], preferred_element_type=jnp.float32)
            tt += jnp.dot(ab[:, 2 * K:], ws_ref[k], preferred_element_type=jnp.float32)
    zr = rr - ii + br_ref[...]
    zi = tt - rr - ii + bi_ref[...]
    or_ref[...] = zr
    oi_ref[...] = zi
    _stats_epilogue(zr, zi, sum_ref, ssq_ref)


def bn_residual_kernel(zr_ref, zi_ref, idr_ref, idi_ref, sc_ref, sh_ref,
                       yr_ref, yi_ref):
    """bn3 (no ReLU) phase restore + residual add.  The module's final
    ReLU(|out|)*exp(i*stable_angle(out)) is exactly the identity on the sum."""
    hr, hi = _bn_phase(zr_ref[...], zi_ref[...], sc_ref[...], sh_ref[...], relu=False)
    yr_ref[...] = hr + idr_ref[...]
    yi_ref[...] = hi + idi_ref[...]


# ----------------------------------------------------------------------------
# pltpu.roll direction probe (guards against rotate-convention ambiguity).
# Runs under ensure_compile_time_eval so it is safe to hit during jit tracing.
# ----------------------------------------------------------------------------
@functools.lru_cache(maxsize=None)
def _roll_matches_jnp():
    """True iff pltpu.roll(x, s, axis) == jnp.roll(x, s, axis), i.e. out[i] = x[i-s]."""
    def k(x_ref, o_ref):
        o_ref[...] = pltpu.roll(x_ref[...], shift=1, axis=0)
    with jax.ensure_compile_time_eval():
        x = jnp.tile(jnp.arange(8, dtype=jnp.float32)[:, None], (1, 128))
        y = pl.pallas_call(k, out_shape=jax.ShapeDtypeStruct((8, 128), jnp.float32))(x)
        return bool(y[1, 0] == 0.0)


# ----------------------------------------------------------------------------
# Wrappers
# ----------------------------------------------------------------------------
def _row_tile(M, target=512):
    # Big tiles amortize per-grid-step overhead; target=512 keeps the matmul
    # VMEM footprint comfortably under the v7x 32 MiB scoped default.
    if M <= target:
        return M
    for tm in (target, 256, 128, 64, 32, 16, 8):
        if M % tm == 0:
            return tm
    return M


def _bf16_w(wr, wi):
    return wr.astype(jnp.bfloat16), wi.astype(jnp.bfloat16), (wr + wi).astype(jnp.bfloat16)


def conv1x1_stats(ar, ai, wr, wi, br, bi):
    M, K = ar.shape
    C = wr.shape[1]
    tm = _row_tile(M)
    G = M // tm
    wrb, wib, wsb = _bf16_w(wr, wi)
    row_in = pl.BlockSpec((tm, K), lambda i: (i, 0))
    row_out = pl.BlockSpec((tm, C), lambda i: (i, 0))
    w_spec = pl.BlockSpec((K, C), lambda i: (0, 0))
    v_spec = pl.BlockSpec((1, C), lambda i: (0, 0))
    st_spec = pl.BlockSpec((1, 1, C), lambda i: (i, 0, 0))
    return pl.pallas_call(
        conv1x1_stats_kernel,
        out_shape=(jax.ShapeDtypeStruct((M, C), jnp.float32),
                   jax.ShapeDtypeStruct((M, C), jnp.float32),
                   jax.ShapeDtypeStruct((G, 1, C), jnp.float32),
                   jax.ShapeDtypeStruct((G, 1, C), jnp.float32)),
        grid=(G,),
        in_specs=[row_in, row_in, w_spec, w_spec, w_spec, v_spec, v_spec],
        out_specs=(row_out, row_out, st_spec, st_spec),
        compiler_params=pltpu.CompilerParams(dimension_semantics=("parallel",)),
    )(ar, ai, wrb, wib, wsb, br, bi)


def bn_conv1x1_stats(zr, zi, scale, shift, wr, wi, br, bi):
    M, K = zr.shape
    C = wr.shape[1]
    tm = _row_tile(M)
    G = M // tm
    wrb, wib, wsb = _bf16_w(wr, wi)
    row_in = pl.BlockSpec((tm, K), lambda i: (i, 0))
    row_out = pl.BlockSpec((tm, C), lambda i: (i, 0))
    w_spec = pl.BlockSpec((K, C), lambda i: (0, 0))
    vk_spec = pl.BlockSpec((1, K), lambda i: (0, 0))
    vc_spec = pl.BlockSpec((1, C), lambda i: (0, 0))
    st_spec = pl.BlockSpec((1, 1, C), lambda i: (i, 0, 0))
    return pl.pallas_call(
        bn_conv1x1_stats_kernel,
        out_shape=(jax.ShapeDtypeStruct((M, C), jnp.float32),
                   jax.ShapeDtypeStruct((M, C), jnp.float32),
                   jax.ShapeDtypeStruct((G, 1, C), jnp.float32),
                   jax.ShapeDtypeStruct((G, 1, C), jnp.float32)),
        grid=(G,),
        in_specs=[row_in, row_in, vk_spec, vk_spec,
                  w_spec, w_spec, w_spec, vc_spec, vc_spec],
        out_specs=(row_out, row_out, st_spec, st_spec),
        compiler_params=pltpu.CompilerParams(dimension_semantics=("parallel",)),
    )(zr, zi, scale, shift, wrb, wib, wsb, br, bi)


def bn_conv3x3_stats(zr, zi, scale, shift, w9r, w9i, br, bi, hpos, wpos, N, H, W):
    HW = H * W
    assert HW % 8 == 0, (H, W)
    K = zr.shape[1]
    C = w9r.shape[-1]
    w9rb, w9ib, w9sb = _bf16_w(w9r, w9i)
    img_in = pl.BlockSpec((HW, K), lambda n: (n, 0))
    img_out = pl.BlockSpec((HW, C), lambda n: (n, 0))
    vk_spec = pl.BlockSpec((1, K), lambda n: (0, 0))
    vc_spec = pl.BlockSpec((1, C), lambda n: (0, 0))
    w_spec = pl.BlockSpec((9, K, C), lambda n: (0, 0, 0))
    pos_spec = pl.BlockSpec((HW, 1), lambda n: (0, 0))
    st_spec = pl.BlockSpec((1, 1, C), lambda n: (n, 0, 0))
    kernel = functools.partial(bn_conv3x3_stats_kernel, H=H, W=W,
                               roll_like_jnp=_roll_matches_jnp())
    return pl.pallas_call(
        kernel,
        out_shape=(jax.ShapeDtypeStruct((N * HW, C), jnp.float32),
                   jax.ShapeDtypeStruct((N * HW, C), jnp.float32),
                   jax.ShapeDtypeStruct((N, 1, C), jnp.float32),
                   jax.ShapeDtypeStruct((N, 1, C), jnp.float32)),
        grid=(N,),
        in_specs=[pos_spec, pos_spec, img_in, img_in, vk_spec, vk_spec,
                  w_spec, w_spec, w_spec, vc_spec, vc_spec],
        out_specs=(img_out, img_out, st_spec, st_spec),
        compiler_params=pltpu.CompilerParams(dimension_semantics=("parallel",)),
    )(hpos, wpos, zr, zi, scale, shift, w9rb, w9ib, w9sb, br, bi)


def bn_residual(zr, zi, idr, idi, scale, shift):
    M, C = zr.shape
    tm = _row_tile(M)
    row = pl.BlockSpec((tm, C), lambda i: (i, 0))
    vec = pl.BlockSpec((1, C), lambda i: (0, 0))
    return pl.pallas_call(
        bn_residual_kernel,
        out_shape=(jax.ShapeDtypeStruct((M, C), jnp.float32),
                   jax.ShapeDtypeStruct((M, C), jnp.float32)),
        grid=(M // tm,),
        in_specs=[row, row, row, row, vec, vec],
        out_specs=(row, row),
        compiler_params=pltpu.CompilerParams(dimension_semantics=("parallel",)),
    )(zr, zi, idr, idi, scale, shift)


def bn_scale_shift(psum, pssq, count, gamma, beta):
    """Training-mode BN of |z| folded into per-channel scale/shift (biased var)."""
    mean = jnp.sum(psum, axis=0) / count          # (1, C)
    ex2 = jnp.sum(pssq, axis=0) / count
    var = jnp.maximum(ex2 - mean * mean, 0.0)
    invstd = jax.lax.rsqrt(var + BN_EPS)
    scale = gamma * invstd
    shift = beta - mean * scale
    return scale, shift


# ----------------------------------------------------------------------------
# Glue: padding, weight reshapes, positions, parameters, full forward
# ----------------------------------------------------------------------------
def _round_up(c, m=128):
    return ((c + m - 1) // m) * m


def _pad_cols(a, cp):
    c = a.shape[-1]
    if c == cp:
        return a
    return jnp.pad(a, [(0, 0)] * (a.ndim - 1) + [(0, cp - c)])


def _w1x1_mat(w, cin_p, cout_p):
    # torch OIHW (O, I, 1, 1) -> (I, O), zero-padded to (cin_p, cout_p)
    m = jnp.transpose(w[:, :, 0, 0], (1, 0))
    return jnp.pad(m, ((0, cin_p - m.shape[0]), (0, cout_p - m.shape[1])))


def _w3x3_taps(w, cin_p, cout_p):
    # torch OIHW (O, I, 3, 3) -> (9, I, O), tap order k = kh*3 + kw, zero-padded
    o, i, kh, kw = w.shape
    m = jnp.transpose(w, (2, 3, 1, 0)).reshape(kh * kw, i, o)
    return jnp.pad(m, ((0, 0), (0, cin_p - i), (0, cout_p - o)))


def _conv3x3_pos(H, W):
    # (HW, 1) f32 row / col indices; masks are derived from these in-kernel.
    h = jnp.arange(H, dtype=jnp.float32)
    w = jnp.arange(W, dtype=jnp.float32)
    hh = jnp.broadcast_to(h[:, None], (H, W)).reshape(H * W, 1)
    ww = jnp.broadcast_to(w[None, :], (H, W)).reshape(H * W, 1)
    return hh, ww


def make_params(key, inplanes, planes, base_width=64, groups=1):
    expansion = 4
    width = int(planes * (base_width / 64.0)) * groups
    outp = planes * expansion

    def conv_p(k, cout, cin, kh, kw):
        kr, ki, kbr, kbi = jax.random.split(k, 4)
        s = 1.0 / jnp.sqrt(cin * kh * kw)
        wr = jax.random.normal(kr, (cout, cin, kh, kw), jnp.float32) * s
        wi = jax.random.normal(ki, (cout, cin, kh, kw), jnp.float32) * s
        br = jax.random.normal(kbr, (1, cout), jnp.float32) * s
        bi = jax.random.normal(kbi, (1, cout), jnp.float32) * s
        return wr, wi, br, bi

    k1, k2, k3 = jax.random.split(key, 3)
    return {
        "conv1": conv_p(k1, width, inplanes, 1, 1),
        "conv2": conv_p(k2, width, width, 3, 3),
        "conv3": conv_p(k3, outp, width, 1, 1),
        # BatchNorm2d default init: weight = 1, bias = 0
        "bn1": (jnp.ones((1, width), jnp.float32), jnp.zeros((1, width), jnp.float32)),
        "bn2": (jnp.ones((1, width), jnp.float32), jnp.zeros((1, width), jnp.float32)),
        "bn3": (jnp.ones((1, outp), jnp.float32), jnp.zeros((1, outp), jnp.float32)),
    }


def bottleneck_forward(x, params, stride=1):
    """x: complex64 (N, C, H, W).  Returns complex64 (N, planes*4, H, W)."""
    w1r, w1i, b1r, b1i = params["conv1"]
    w2r, w2i, b2r, b2i = params["conv2"]
    w3r, w3i, b3r, b3i = params["conv3"]
    g1, be1 = params["bn1"]
    g2, be2 = params["bn2"]
    g3, be3 = params["bn3"]

    width = w1r.shape[0]
    outp = w3r.shape[0]
    N, Cin, H, W = x.shape
    assert stride == 1 and Cin == outp, \
        "identity path requires stride=1 and inplanes == planes*expansion"

    cin_p = _round_up(Cin)
    wid_p = _round_up(width)
    out_p = _round_up(outp)
    HW = H * W
    M = N * HW

    # NCHW complex -> (M, C) real/imag planes, channels zero-padded to 128 lanes
    xr = jnp.transpose(jnp.real(x).astype(jnp.float32), (0, 2, 3, 1)).reshape(M, Cin)
    xi = jnp.transpose(jnp.imag(x).astype(jnp.float32), (0, 2, 3, 1)).reshape(M, Cin)
    ar = _pad_cols(xr, cin_p)
    ai = _pad_cols(xi, cin_p)

    # --- conv1 (1x1) + |z| stats ---------------------------------------------
    z1r, z1i, s1, q1 = conv1x1_stats(
        ar, ai,
        _w1x1_mat(w1r, cin_p, wid_p), _w1x1_mat(w1i, cin_p, wid_p),
        _pad_cols(b1r, wid_p), _pad_cols(b1i, wid_p))
    sc1, sh1 = bn_scale_shift(s1, q1, M, _pad_cols(g1, wid_p), _pad_cols(be1, wid_p))

    # --- bn1+ReLU+phase fused into conv2 (3x3, pad=1) + stats ------------------
    hpos, wpos = _conv3x3_pos(H, W)
    z2r, z2i, s2, q2 = bn_conv3x3_stats(
        z1r, z1i, sc1, sh1,
        _w3x3_taps(w2r, wid_p, wid_p), _w3x3_taps(w2i, wid_p, wid_p),
        _pad_cols(b2r, wid_p), _pad_cols(b2i, wid_p),
        hpos, wpos, N, H, W)
    sc2, sh2 = bn_scale_shift(s2, q2, M, _pad_cols(g2, wid_p), _pad_cols(be2, wid_p))

    # --- bn2+ReLU+phase fused into conv3 (1x1) + stats -------------------------
    z3r, z3i, s3, q3 = bn_conv1x1_stats(
        z2r, z2i, sc2, sh2,
        _w1x1_mat(w3r, wid_p, out_p), _w1x1_mat(w3i, wid_p, out_p),
        _pad_cols(b3r, out_p), _pad_cols(b3i, out_p))
    sc3, sh3 = bn_scale_shift(s3, q3, M, _pad_cols(g3, out_p), _pad_cols(be3, out_p))

    # --- bn3 + residual add (final ReLU(|.|)*phase is exactly identity) -------
    yr, yi = bn_residual(z3r, z3i, ar, ai, sc3, sh3)

    # un-pad channels, back to NCHW complex
    yr = jnp.transpose(yr[:, :outp].reshape(N, H, W, outp), (0, 3, 1, 2))
    yi = jnp.transpose(yi[:, :outp].reshape(N, H, W, outp), (0, 3, 1, 2))
    return (yr + 1j * yi).astype(jnp.complex64)


# ----------------------------------------------------------------------------
if __name__ == "__main__":
    # Bottleneck(inplanes=16, planes=4) -> width=4, output channels = 16
    inplanes, planes = 16, 4
    N, H, W = 2, 16, 16

    key = jax.random.PRNGKey(0)
    kx_r, kx_i, kp = jax.random.split(key, 3)
    x = (jax.random.normal(kx_r, (N, inplanes, H, W), jnp.float32)
         + 1j * jax.random.normal(kx_i, (N, inplanes, H, W), jnp.float32)
         ).astype(jnp.complex64)

    params = make_params(kp, inplanes, planes)

    _roll_matches_jnp()                      # prime the roll-direction probe eagerly
    fwd = jax.jit(bottleneck_forward)
    out = jax.block_until_ready(fwd(x, params))

    assert out.shape == (N, planes * 4, H, W), out.shape
    assert out.dtype == jnp.complex64, out.dtype
    assert bool(jnp.all(jnp.isfinite(jnp.real(out)) & jnp.isfinite(jnp.imag(out))))
    print("KERNEL_OK")
</pallas_src>

<mosaic_0001>
module attributes {stable_mosaic.version = 11 : i64} {
  func.func @k(%arg0: memref<8x128xf32, #tpu.memory_space<vmem>>, %arg1: memref<8x128xf32, #tpu.memory_space<vmem>>) attributes {dimension_semantics = [], scalar_prefetch = 0 : i64, scratch_operands = 0 : i64, tpu.core_type = #tpu.core_type<tc>} {
    %c0 = arith.constant 0 : index
    %c0_0 = arith.constant 0 : index
    %0 = vector.load %arg0[%c0, %c0_0] : memref<8x128xf32, #tpu.memory_space<vmem>>, vector<8x128xf32>
    %c1_i32 = arith.constant 1 : i32
    %1 = tpu.dynamic_rotate %0 by %c1_i32 dim 0 : vector<8x128xf32>, i32 -> vector<8x128xf32>
    %c0_1 = arith.constant 0 : index
    %c0_2 = arith.constant 0 : index
    %2 = vector.load %arg1[%c0_1, %c0_2] : memref<8x128xf32, #tpu.memory_space<vmem>>, vector<8x128xf32>
    tpu.vector_store %arg1[%c0_1, %c0_2], %1 {strides = array<i32>} : memref<8x128xf32, #tpu.memory_space<vmem>>, vector<8x128xf32>,
    return
  }
}

</mosaic_0001>

<bundles_post_ra>
// kernel: tpu_custom_call.1
= control target key start
LH: loop header
LB: loop body
LE: loop exit
PB: predicated region body
PF: predicated region fallthrough
CT: control target
= control target key end

     0   :  { %6 = vsyncpa [#allocation3], 0  ;;  %s125_s0 = inlined_call_operand.hbm [shape: f32[8,128], index: 0, kind: input, shape index: {}]   ;;  %s126_s1 = inlined_call_operand.hbm [shape: f32[8,128], index: 1, kind: output, shape index: {}]  }
   0x1   :  { %7 = vsyncpa [#allocation4], 0  ;;  %s89_s6 = smov [#allocation2]   ;;  %s41_s10 = scalar_lea.hbm %s125_s0, 128 }
   0x2   :  { %s14_s7 = sshll.u32 %s89_s6, 4  ;;  %p42_p0 = scmp.ne.s32.totalorder %s125_s0, %s41_s10  ;;  %s15_s7 = int_to_ptr.vmem [resolvable:$true] %s14_s7 }
   0x3   :  { %p45_p1 = scmp.lt.u32.totalorder %s41_s10, %s125_s0 }
   0x5   :  { %p47_p2 = pnand %p45_p1, %p42_p0 }
   0x7   :  { %50 = shalt.err (!%p47_p2)
}
   0x8   :  { %s51_s15 = scalar_lea.vmem %s15_s7, 128  ;;  %p56_p4 = scmp.lt.s32.totalorder %s15_s7, %s15_s7 }
   0x9   :  { %p52_p3 = scmp.ne.s32.totalorder %s15_s7, %s51_s15  ;;  %p57_p5 = scmp.lt.s32.totalorder %s51_s15, %s51_s15 }
   0xb   :  { %p58_p6 = por %p57_p5, %p56_p4 }
   0xd   :  { %p59_p7 = pnand %p58_p6, %p52_p3 }
   0xf   :  { %62 = shalt.err (!%p59_p7)
}
  0x10   :  { %17 = dma.hbm_to_vmem [thread:$0]  %s125_s0, 128, %s15_s7, [#allocation3]  }
  0x11   :  { %85 = dma.done.wait [#allocation3], 128  }
  0x12   :  { %86 = vsyncadd [#allocation3], 4294967168  ;;  %s90_s18 = smov [#allocation5]   ;;  %v21_v0 = vld [vmem:[#allocation2] sm:$0xff] }
  0x13   :  { %s30_s19 = sshll.u32 %s90_s18, 4  ;;  %v22_v1 = vrot.slane %v21_v0, 7  ;;  %s31_s19 = int_to_ptr.vmem [resolvable:$true] %s30_s19 }
  0x14   :  { %s63_s20 = scalar_lea.vmem %s31_s19, 128  ;;  %p68_p9 = scmp.lt.s32.totalorder %s31_s19, %s31_s19 }
  0x15   :  { %23 = vst [vmem:[#allocation5] sm:$0xff] %v22_v1  ;;  %p64_p8 = scmp.ne.s32.totalorder %s31_s19, %s63_s20  ;;  %p69_p10 = scmp.lt.s32.totalorder %s63_s20, %s63_s20 }
  0x17   :  { %p70_p11 = por %p69_p10, %p68_p9 }
  0x19   :  { %p71_p12 = pnand %p70_p11, %p64_p8 }
  0x1b   :  { %74 = shalt.err (!%p71_p12)
}
  0x1c   :  { %s75_s23 = scalar_lea.hbm %s126_s1, 128 }
  0x1d   :  { %p76_p13 = scmp.ne.s32.totalorder %s126_s1, %s75_s23  ;;  %p79_p0 = scmp.lt.u32.totalorder %s75_s23, %s126_s1 }
  0x1f   :  { %p81_p1 = pnand %p79_p0, %p76_p13 }
  0x21   :  { %84 = shalt.err (!%p81_p1)
}
  0x22   :  { %33 = dma.vmem_to_hbm [thread:$0]  %s31_s19, 128, %s126_s1, [#allocation4]  }
  0x23   :  { %87 = dma.done.wait [#allocation4], 128  }
  0x24   :  { %88 = vsyncadd [#allocation4], 4294967168 }
  0x25   :  { %37 = vsyncpa [#allocation3], 1 }
  0x26   :  { %38 = vsyncpa [#allocation4], 1 }

</bundles_post_ra>
